<compile_context>
chip_gen: v7x
topology: tpu7x:2x2x1
jax: 0.10.0
libtpu: 0.0.40
codegen_flags: <defaults>
</compile_context>

<pallas_src>
import functools

import jax
import jax.numpy as jnp
from jax.experimental import pallas as pl
from jax.experimental.pallas import tpu as pltpu


def _round_up(x, m):
    return ((x + m - 1) // m) * m


def _cdiv(a, b):
    return (a + b - 1) // b


def _conv_matmul_kernel(a_ref, w_ref, b_ref, o_ref):
    """relu(W @ A + b) for one batch-folded M tile.

    a_ref: (K, TM)        bf16  im2col patch columns
    w_ref: (Cout_pad, K)  bf16  reshaped conv weight (resident)
    b_ref: (Cout_pad, 1)  f32   bias (resident)
    o_ref: (Cout_pad, TM) f32
    """
    acc = jnp.dot(w_ref[...], a_ref[...], preferred_element_type=jnp.float32)
    acc = acc + b_ref[...]              # f32 VPU add, lane-broadcast bias
    o_ref[...] = jnp.maximum(acc, 0.0)  # f32 epilogue, lane-dense store


def _patches_k_major(x_bf16, kh, kw, stride, oh, ow):
    """(N, Cin, H, W) bf16 -> (Cin*kh*kw, N*oh*ow) bf16 in one XLA pass.

    Feature ordering is (c, kh, kw) with kw fastest (rhs spec "OIHW"), which
    matches weight.reshape(Cout, Cin*kh*kw).  Output spec "CNHW" yields the
    K-major, batch-folded layout directly, so the reshape below is copy-free.
    """
    n = x_bf16.shape[0]
    p = jax.lax.conv_general_dilated_patches(
        x_bf16, filter_shape=(kh, kw), window_strides=(stride, stride),
        padding="VALID", dimension_numbers=("NCHW", "OIHW", "CNHW"))
    return p.reshape(p.shape[0], n * oh * ow)


def _plan_tiles(m, kdim, cout_pad):
    """VMEM-aware, generation-portable tile plan for the M (lane) axis.

    Returns (tm, m_pad, vmem_limit_bytes).  Padding waste is bounded by
    ~(steps-1)*128 lanes (tile-agnostic), TM grows up to 2048 lanes when VMEM
    allows, and >=2 grid steps are kept when there is enough work (v7x has
    two TensorCores; on v5e/v6e the extra step is harmless).
    """
    n128 = max(1, _cdiv(m, 128))
    try:  # physical VMEM per core: 128 MiB (v5e/v6e), 64 MiB (v7x)
        vmem_cap = int(pltpu.get_tpu_info().vmem_capacity_bytes)
    except Exception:  # conservative fallback = smallest generation (v7x)
        vmem_cap = 64 * 1024 * 1024
    budget = min(vmem_cap // 2, 32 * 1024 * 1024)        # working-set budget
    resident = cout_pad * kdim * 2 + cout_pad * 4 + (64 << 10)
    per_lane = 3 * kdim * 2 + 2 * cout_pad * 4           # A x3 bf16 + out x2 f32
    lane_cap = max(128, (budget - resident) // per_lane)
    tm_cap = min(2048, (lane_cap // 128) * 128)
    steps = _cdiv(n128 * 128, tm_cap)
    if n128 >= 2:
        steps = max(steps, 2)                            # keep both v7x TCs busy
    tm = _cdiv(n128, steps) * 128
    m_pad = steps * tm
    vmem_limit = int(min(vmem_cap * 3 // 4, 96 * 1024 * 1024))
    return tm, m_pad, vmem_limit


@functools.partial(jax.jit, static_argnames=("stride",))
def simconv_forward(x, weight, bias, *, stride):
    """relu(conv2d(x, weight, bias, stride=stride, padding=0)), NCHW in/out."""
    n, cin, h, w = x.shape
    cout, _, kh, kw = weight.shape
    oh = (h - kh) // stride + 1
    ow = (w - kw) // stride + 1
    m = n * oh * ow                       # batch-folded output positions
    kdim = cin * kh * kw
    cout_pad = _round_up(cout, 8)         # only sublane alignment needed here

    tm, m_pad, vmem_limit = _plan_tiles(m, kdim, cout_pad)
    grid = (m_pad // tm,)

    # A: (K, M) bf16 patches, single pass, padded once on the lane axis.
    a = _patches_k_major(x.astype(jnp.bfloat16), kh, kw, stride, oh, ow)
    if m_pad != m:
        a = jnp.pad(a, ((0, 0), (0, m_pad - m)))

    # Weight / bias.  Padded Cout rows stay exactly zero (zero weights + zero
    # bias -> relu(0) = 0) and are sliced off after the kernel.
    wt = weight.reshape(cout, kdim).astype(jnp.bfloat16)
    bias2d = bias.astype(jnp.float32).reshape(cout, 1)
    if cout_pad != cout:
        wt = jnp.pad(wt, ((0, cout_pad - cout), (0, 0)))
        bias2d = jnp.pad(bias2d, ((0, cout_pad - cout), (0, 0)))

    # Deepen the A pipeline only when there are enough steps to benefit.
    a_kwargs = {"pipeline_mode": pl.Buffered(3)} if grid[0] >= 3 else {}
    in_specs = [
        pl.BlockSpec((kdim, tm), lambda mi: (0, mi), **a_kwargs),   # A tile
        pl.BlockSpec((cout_pad, kdim), lambda mi: (0, 0)),          # W resident
        pl.BlockSpec((cout_pad, 1), lambda mi: (0, 0)),             # bias resident
    ]
    out_spec = pl.BlockSpec((cout_pad, tm), lambda mi: (0, mi))

    flops = 2 * cout_pad * kdim * m_pad
    bytes_accessed = (a.size * 2) + (wt.size * 2) + (bias2d.size * 4) \
                     + (cout_pad * m_pad * 4)

    out_p = pl.pallas_call(
        _conv_matmul_kernel,
        out_shape=jax.ShapeDtypeStruct((cout_pad, m_pad), jnp.float32),
        grid_spec=pltpu.PrefetchScalarGridSpec(
            num_scalar_prefetch=0,
            grid=grid,
            in_specs=in_specs,
            out_specs=out_spec,
        ),
        compiler_params=pltpu.CompilerParams(
            dimension_semantics=("parallel",),
            vmem_limit_bytes=vmem_limit),
        cost_estimate=pl.CostEstimate(
            flops=flops, transcendentals=0, bytes_accessed=bytes_accessed),
    )(a, wt, bias2d)

    # (Cout_pad, M_pad) -> NCHW.  One output-sized copy (the price of folding
    # the batch into the lane axis); small next to the K*M patch traffic.
    # TODO(synk): for large OH*OW a per-image grid avoids this transpose.
    out = out_p[:cout, :m].reshape(cout, n, oh, ow).transpose(1, 0, 2, 3)
    return out


if __name__ == "__main__":
    # SimConv(in_channels=4, out_channels=8, kernel_size=3, stride=2)
    N, CIN, H, W = 2, 4, 16, 16
    COUT, KSIZE, STRIDE = 8, 3, 2

    key = jax.random.PRNGKey(0)
    kx, kw_, kb = jax.random.split(key, 3)
    x = jax.random.normal(kx, (N, CIN, H, W), dtype=jnp.float32)
    # Deterministic parameter init (mirrors Conv2d parameter shapes / scaling).
    fan_in = CIN * KSIZE * KSIZE
    bound = 1.0 / (fan_in ** 0.5)
    weight = jax.random.uniform(kw_, (COUT, CIN, KSIZE, KSIZE), jnp.float32,
                                -bound, bound)
    bias = jax.random.uniform(kb, (COUT,), jnp.float32, -bound, bound)

    out = simconv_forward(x, weight, bias, stride=STRIDE)
    jax.block_until_ready(out)

    # Reference: XLA conv + relu in f32.  The kernel feeds the MXU bf16
    # operands with f32 accumulation (intentional accuracy trade), hence the
    # loosened tolerance.
    ref = jax.lax.conv_general_dilated(
        x, weight, window_strides=(STRIDE, STRIDE), padding="VALID",
        dimension_numbers=("NCHW", "OIHW", "NCHW"))
    ref = jnp.maximum(ref + bias[None, :, None, None], 0.0)
    assert out.shape == ref.shape, (out.shape, ref.shape)
    max_err = float(jnp.max(jnp.abs(out - ref)))
    assert jnp.allclose(out, ref, atol=2e-2, rtol=2e-2), max_err

    print("KERNEL_OK")
</pallas_src>

<mosaic_0001>
module attributes {stable_mosaic.version = 11 : i64} {
  func.func @_conv_matmul_kernel(%arg0: i32, %arg1: memref<36x128xbf16, #tpu.memory_space<vmem>>, %arg2: memref<8x36xbf16, #tpu.memory_space<vmem>>, %arg3: memref<8x1xf32, #tpu.memory_space<vmem>>, %arg4: memref<8x128xf32, #tpu.memory_space<vmem>>) attributes {dimension_semantics = [#tpu.dimension_semantics<parallel>], iteration_bounds = array<i64: 1>, scalar_prefetch = 0 : i64, scratch_operands = 0 : i64, tpu.core_type = #tpu.core_type<tc>, window_params = [{transform_indices = @transform_0, window_bounds = array<i64: 36, 128>}, {pipeline_mode = #tpu.pipeline_mode<synchronous>, transform_indices = @transform_1, window_bounds = array<i64: 8, 36>}, {pipeline_mode = #tpu.pipeline_mode<synchronous>, transform_indices = @transform_2, window_bounds = array<i64: 8, 1>}, {transform_indices = @transform_3, window_bounds = array<i64: 8, 128>}]} {
    %c0 = arith.constant 0 : index
    %c0_0 = arith.constant 0 : index
    %0 = vector.load %arg2[%c0, %c0_0] : memref<8x36xbf16, #tpu.memory_space<vmem>>, vector<8x36xbf16>
    %c0_1 = arith.constant 0 : index
    %c0_2 = arith.constant 0 : index
    %1 = vector.load %arg1[%c0_1, %c0_2] : memref<36x128xbf16, #tpu.memory_space<vmem>>, vector<36x128xbf16>
    %cst = arith.constant dense<0.000000e+00> : vector<8x128xf32>
    %2 = tpu.matmul %0, %1, %cst {dimension_numbers = #tpu.dot_dimension_numbers<[1], [0], [0], [1], [0, 0, 1, 1], [], []>} : vector<8x36xbf16>, vector<36x128xbf16>, vector<8x128xf32> -> vector<8x128xf32>
    %c0_3 = arith.constant 0 : index
    %c0_4 = arith.constant 0 : index
    %3 = vector.load %arg3[%c0_3, %c0_4] : memref<8x1xf32, #tpu.memory_space<vmem>>, vector<8x1xf32>
    %4 = vector.broadcast %3 : vector<8x1xf32> to vector<8x128xf32>
    %5 = arith.addf %2, %4 : vector<8x128xf32>
    %cst_5 = arith.constant 0.000000e+00 : f32
    %6 = vector.broadcast %cst_5 : f32 to vector<8x128xf32>
    %7 = arith.maximumf %5, %6 : vector<8x128xf32>
    %c0_6 = arith.constant 0 : index
    %c0_7 = arith.constant 0 : index
    %8 = vector.load %arg4[%c0_6, %c0_7] : memref<8x128xf32, #tpu.memory_space<vmem>>, vector<8x128xf32>
    tpu.vector_store %arg4[%c0_6, %c0_7], %7 {strides = array<i32>} : memref<8x128xf32, #tpu.memory_space<vmem>>, vector<8x128xf32>,
    return
  }
  func.func @transform_0(%arg0: i32) -> (i32, i32) {
    %c0_i32 = arith.constant 0 : i32
    %c0_i32_0 = arith.constant 0 : i32
    return %c0_i32, %arg0 : i32, i32
  }
  func.func @transform_1(%arg0: i32) -> (i32, i32) {
    %c0_i32 = arith.constant 0 : i32
    %c0_i32_0 = arith.constant 0 : i32
    %c0_i32_1 = arith.constant 0 : i32
    return %c0_i32, %c0_i32_0 : i32, i32
  }
  func.func @transform_2(%arg0: i32) -> (i32, i32) {
    %c0_i32 = arith.constant 0 : i32
    %c0_i32_0 = arith.constant 0 : i32
    %c0_i32_1 = arith.constant 0 : i32
    return %c0_i32, %c0_i32_0 : i32, i32
  }
  func.func @transform_3(%arg0: i32) -> (i32, i32) {
    %c0_i32 = arith.constant 0 : i32
    %c0_i32_0 = arith.constant 0 : i32
    return %c0_i32, %arg0 : i32, i32
  }
}

</mosaic_0001>

<bundles_post_ra>
// kernel: simconv_forward.1
= control target key start
LH: loop header
LB: loop body
LE: loop exit
PB: predicated region body
PF: predicated region fallthrough
CT: control target
= control target key end

     0   :  { %v121_v0 = vmov 0.0   ;;  %vm122_vm0 = vmmov 0   ;;  %v123_v2 = vmov 0   ;;  %vm46_vm1 = vcmask 1041408   ;;  %s162_s0 = inlined_call_operand.vmem [shape: bf16[36,128], index: 0, kind: input, shape index: {}]   ;;  %s163_s2 = inlined_call_operand.vmem [shape: f32[8,1], index: 2, kind: input, shape index: {}]   ;;  %s164_s1 = inlined_call_operand.vmem [shape: bf16[8,36], index: 1, kind: input, shape index: {}]   ;;  %s165_s3 = inlined_call_operand.vmem [shape: f32[8,128], index: 3, kind: output, shape index: {}]  }
   0x1   :  { %104 = vmatprep.subr.bf16.mxu0 %v121_v0  ;;  %v118_v1 = vld [vmem:[%s162_s0] sm:$0xff]   ;;  %110 = vmatprep.mubr.msk.bf16.mxu0 %vm122_vm0, %v121_v0  ;;  %v119_v3 = vld [vmem:[%s162_s0 + $0x8] sm:$0xff]   ;;  %v120_v5 = vld [vmem:[%s162_s0 + $0x10] ss:$0 sps:$4 sm:$0x33]   ;;  %vm42_vm2 = vcmask 293888  }
   0x2   :  { %117 = vset.pattern.permute.xlu0 %v123_v2  ;;  %105 = vmatpush3.bf16.msra.mxu0 %v118_v1  ;;  %v21_v4 = vld [vmem:[%s163_s2] sm:$0xff]  ;;  %v48_v6 = vsel %vm46_vm1, %v120_v5, 0 }
   0x3   :  { %106 = vmatprep.subr.bf16.mxu0 %v121_v0  ;;  %24 = vperm.xlu0 %117, %v21_v4   ;;  %v15_v7 = vld [vmem:[%s164_s1] sm:$0xf] }
   0x6   :  { %107 = vmatpush3.bf16.msra.mxu0 %v119_v3 }
   0x7   :  { %108 = vmatprep.subr.bf16.mxu0 %v121_v0 }
   0xa   :  { %109 = vmatpush3.bf16.msra.mxu0 %v48_v6 }
   0xd   :  { %111 = vmatmul.mubr.msk.bf16.vlgmr.msra.gmra.mrb[0].mxu0 %vm42_vm2, %v15_v7 }
  0x82   :  { %v25_v8 = vpop.permute.xlu0 %24 }
  0xe0   :  { %v84_v9 = vpop.f32.mrb[0].mxu0 }
  0xe1   :  { %v85_v10 = vadd.f32 %v84_v9, %v25_v8  ;;  %v112_v11 = vpop.f32.mrb[1].mxu0 }
  0xe2   :  { %v87_v12 = vpop.f32.mrb[2].mxu0 }
  0xe3   :  { %v90_v13 = vmax.f32 %v85_v10, 0.0  ;;  %v113_v14 = vpop.f32.mrb[3].mxu0 }
  0xe5   :  { %91 = vst [vmem:[%s165_s3] sm:$0xff] %v90_v13 }

</bundles_post_ra>
